<compile_context>
chip_gen: v5e
topology: v5e:2x2
jax: 0.10.0
libtpu: 0.0.40
codegen_flags: <defaults>
</compile_context>

<pallas_src>
import functools

import jax
import jax.numpy as jnp
from jax.experimental import pallas as pl
from jax.experimental.pallas import tpu as pltpu


def _round_up(a, m):
    return (a + m - 1) // m * m


def _pad2(a, rows, cols):
    pr, pc = rows - a.shape[0], cols - a.shape[1]
    if pr or pc:
        a = jnp.pad(a, ((0, pr), (0, pc)))
    return a


def deit_loss_kernel(x_ref, w_ref, b_ref, cls_ref, dist_ref, y_ref, wt_ref,
                     out_ref, acc_ref, *, label_smoothing, num_classes):
    d = pl.program_id(1)

    @pl.when(d == 0)
    def _():
        acc_ref[...] = jnp.zeros_like(acc_ref)

    # Teacher matmul: bf16 operands on the MXU, f32 accumulation in VMEM.
    acc_ref[...] += jnp.dot(x_ref[...], w_ref[...],
                            preferred_element_type=jnp.float32)

    @pl.when(d == pl.num_programs(1) - 1)
    def _():
        Bt, Kp = acc_ref.shape
        neg_big = jnp.finfo(jnp.float32).min

        # f32-accumulated teacher logits (padded lanes masked explicitly below).
        t_logits = acc_ref[...] + b_ref[...].astype(jnp.float32)        # (Bt, Kp)
        class_ids = jax.lax.broadcasted_iota(jnp.int32, (Bt, Kp), 1)
        valid_lane = class_ids < num_classes

        # Teacher argmax over true classes (first-max index == torch.argmax).
        tmax = jnp.max(jnp.where(valid_lane, t_logits, neg_big),
                       axis=1, keepdims=True)
        teacher_y = jnp.min(
            jnp.where(valid_lane & (t_logits == tmax), class_ids, Kp),
            axis=1, keepdims=True)                                       # (Bt, 1)

        row_w = wt_ref[...]                                              # (Bt, 1), 0 for pad rows

        def ce_partial_sum(logits, labels_col, eps):
            # Per-row cross entropy, summed (not averaged) over the B tile.
            logits = logits.astype(jnp.float32)
            m = jnp.max(jnp.where(valid_lane, logits, neg_big),
                        axis=1, keepdims=True)
            shifted = logits - m
            lse = jnp.log(jnp.sum(jnp.where(valid_lane, jnp.exp(shifted), 0.0),
                                  axis=1, keepdims=True))
            logp = shifted - lse
            onehot = class_ids == labels_col
            nll = -jnp.sum(jnp.where(onehot, logp, 0.0), axis=1, keepdims=True)
            if eps > 0.0:
                smooth = -jnp.sum(jnp.where(valid_lane, logp, 0.0),
                                  axis=1, keepdims=True) / num_classes
                per = (1.0 - eps) * nll + eps * smooth
            else:
                per = nll
            return jnp.sum(per * row_w, axis=0, keepdims=True)           # (1, 1)

        l_cls = ce_partial_sum(cls_ref[...], y_ref[...], label_smoothing)
        l_dist = ce_partial_sum(dist_ref[...], teacher_y, 0.0)

        # Single lane-dense (8, 128) output block per B tile:
        #   [0, 0] = sum_i L_cls_i, [0, 1] = sum_i L_distill_i, rest zeros.
        sub = jax.lax.broadcasted_iota(jnp.int32, out_ref.shape, 0)
        lane = jax.lax.broadcasted_iota(jnp.int32, out_ref.shape, 1)
        out_ref[...] = jnp.where((sub == 0) & (lane == 0), l_cls,
                                 jnp.where((sub == 0) & (lane == 1), l_dist,
                                           0.0))


@functools.partial(jax.jit, static_argnames=("label_smoothing", "d_tile"))
def deit_loss(cls_tok, dist_tok, teacher_x, y, teacher_w, teacher_b,
              label_smoothing=0.1, d_tile=512):
    """tokens=(cls_tok, dist_tok), batches=(teacher_x, y);
    returns (L_total, L_cls, L_distill) scalars."""
    B = teacher_x.shape[0]
    D, K = teacher_w.shape

    # --- tile / pad geometry --------------------------------------------------
    K_pad = _round_up(K, 128)                       # lane-dense class axis
    B_tile = 128 if B >= 128 else _round_up(B, 16)  # bf16 sublane / MXU friendly
    B_pad = _round_up(B, B_tile)
    nb = B_pad // B_tile
    D_tile = min(d_tile, _round_up(D, 128))         # reduction tile (fits v7x VMEM)
    D_pad = _round_up(D, D_tile)
    nd = D_pad // D_tile

    # --- operand prep: bf16 matmul operands, everything else untouched -------
    x_flat = _pad2(teacher_x.reshape(B, D).astype(jnp.bfloat16), B_pad, D_pad)
    w_p = _pad2(teacher_w.astype(jnp.bfloat16), D_pad, K_pad)
    b_p = _pad2(teacher_b.reshape(1, K), 1, K_pad)
    cls_p = _pad2(cls_tok, B_pad, K_pad)
    dist_p = _pad2(dist_tok, B_pad, K_pad)
    y_p = _pad2(y.reshape(B, 1).astype(jnp.int32), B_pad, 1)
    wt_p = _pad2(jnp.ones((B, 1), jnp.float32), B_pad, 1)   # 0-weight for pad rows

    kernel = functools.partial(deit_loss_kernel,
                               label_smoothing=float(label_smoothing),
                               num_classes=K)

    grid = (nb, nd)
    in_specs = [
        pl.BlockSpec((B_tile, D_tile), lambda b, d: (b, d)),   # x
        pl.BlockSpec((D_tile, K_pad), lambda b, d: (d, 0)),    # teacher W
        pl.BlockSpec((1, K_pad), lambda b, d: (0, 0)),         # teacher bias
        pl.BlockSpec((B_tile, K_pad), lambda b, d: (b, 0)),    # cls logits
        pl.BlockSpec((B_tile, K_pad), lambda b, d: (b, 0)),    # distill logits
        pl.BlockSpec((B_tile, 1), lambda b, d: (b, 0)),        # labels
        pl.BlockSpec((B_tile, 1), lambda b, d: (b, 0)),        # row weights
    ]
    out_specs = pl.BlockSpec((8, 128), lambda b, d: (b, 0))
    out_shape = jax.ShapeDtypeStruct((nb * 8, 128), jnp.float32)

    cost = pl.CostEstimate(
        flops=int(2 * B_pad * D_pad * K_pad + 16 * B_pad * K_pad),
        transcendentals=int(2 * B_pad * K_pad),
        bytes_accessed=int(x_flat.size * 2 + nb * w_p.size * 2 + b_p.size * 4
                           + cls_p.size * cls_p.dtype.itemsize
                           + dist_p.size * dist_p.dtype.itemsize
                           + y_p.size * 4 + wt_p.size * 4 + nb * 8 * 128 * 4),
    )

    partials = pl.pallas_call(
        kernel,
        out_shape=out_shape,
        grid_spec=pltpu.PrefetchScalarGridSpec(
            num_scalar_prefetch=0,
            grid=grid,
            in_specs=in_specs,
            out_specs=out_specs,
            scratch_shapes=[pltpu.VMEM((B_tile, K_pad), jnp.float32)],
        ),
        compiler_params=pltpu.CompilerParams(
            dimension_semantics=("parallel", "arbitrary"),
            # Tiles above keep double-buffered x/W blocks + the f32 accumulator
            # to a few MiB, safely inside v7x's 64 MiB physical VMEM.
            vmem_limit_bytes=32 * 1024 * 1024,
        ),
        cost_estimate=cost,
    )(x_flat, w_p, b_p, cls_p, dist_p, y_p, wt_p)

    parts = partials.reshape(nb, 8, 128)
    l_cls = jnp.sum(parts[:, 0, 0]) / B
    l_distill = jnp.sum(parts[:, 0, 1]) / B
    l_total = 0.5 * l_cls + 0.5 * l_distill
    return l_total, l_cls, l_distill


def deit_loss_reference(cls_tok, dist_tok, teacher_x, y, w, b, eps):
    """Pure-JAX reference mirroring the PyTorch module semantics (teacher
    matmul in bf16 with f32 accumulation, like the kernel)."""
    B = teacher_x.shape[0]
    x = teacher_x.reshape(B, -1).astype(jnp.bfloat16)
    t_logits = jnp.dot(x, w.astype(jnp.bfloat16),
                       preferred_element_type=jnp.float32) + b.astype(jnp.float32)
    teacher_y = jnp.argmax(t_logits, axis=1)

    def ce(logits, labels, e):
        logp = jax.nn.log_softmax(logits.astype(jnp.float32), axis=1)
        nll = -jnp.take_along_axis(logp, labels[:, None], axis=1)[:, 0]
        if e > 0.0:
            nll = (1.0 - e) * nll + e * (-logp.mean(axis=1))
        return nll.mean()

    l_d = ce(dist_tok, teacher_y, 0.0)
    l_c = ce(cls_tok, y, eps)
    return 0.5 * l_c + 0.5 * l_d, l_c, l_d


if __name__ == "__main__":
    # Small shapes: batch=8, channels=4, spatial=16x16, num_classes=16.
    B, C, H, W, K = 8, 4, 16, 16, 16
    D = C * H * W
    eps = 0.1

    key = jax.random.PRNGKey(0)
    k_x, k_cls, k_dist, k_y, k_w, k_b = jax.random.split(key, 6)

    teacher_x = jax.random.normal(k_x, (B, C, H, W), dtype=jnp.float32)  # NCHW
    cls_tok = jax.random.normal(k_cls, (B, K), dtype=jnp.float32)
    dist_tok = jax.random.normal(k_dist, (B, K), dtype=jnp.float32)
    y = jax.random.randint(k_y, (B,), 0, K, dtype=jnp.int32)

    # Deterministic frozen "teacher": a linear classifier over flattened pixels.
    teacher_w = jax.random.normal(k_w, (D, K), dtype=jnp.float32) * 0.02
    teacher_b = jax.random.normal(k_b, (K,), dtype=jnp.float32) * 0.01

    l_total, l_cls, l_distill = deit_loss(cls_tok, dist_tok, teacher_x, y,
                                          teacher_w, teacher_b,
                                          label_smoothing=eps)
    jax.block_until_ready((l_total, l_cls, l_distill))

    r_total, r_cls, r_distill = deit_loss_reference(cls_tok, dist_tok,
                                                    teacher_x, y,
                                                    teacher_w, teacher_b, eps)
    assert jnp.allclose(l_cls, r_cls, rtol=1e-4, atol=1e-4), (l_cls, r_cls)
    assert jnp.allclose(l_distill, r_distill, rtol=1e-4, atol=1e-4), (l_distill, r_distill)
    assert jnp.allclose(l_total, r_total, rtol=1e-4, atol=1e-4), (l_total, r_total)

    print("KERNEL_OK")
</pallas_src>

<mosaic_0001>
module attributes {stable_mosaic.version = 11 : i64} {
  func.func @deit_loss_kernel(%arg0: i32, %arg1: i32, %arg2: memref<16x512xbf16, #tpu.memory_space<vmem>>, %arg3: memref<512x128xbf16, #tpu.memory_space<vmem>>, %arg4: memref<1x128xf32, #tpu.memory_space<vmem>>, %arg5: memref<16x128xf32, #tpu.memory_space<vmem>>, %arg6: memref<16x128xf32, #tpu.memory_space<vmem>>, %arg7: memref<16x1xi32, #tpu.memory_space<vmem>>, %arg8: memref<16x1xf32, #tpu.memory_space<vmem>>, %arg9: memref<8x128xf32, #tpu.memory_space<vmem>>, %arg10: memref<16x128xf32, #tpu.memory_space<vmem>>) attributes {dimension_semantics = [#tpu.dimension_semantics<parallel>, #tpu.dimension_semantics<arbitrary>], iteration_bounds = array<i64: 1, 2>, scalar_prefetch = 0 : i64, scratch_operands = 1 : i64, tpu.core_type = #tpu.core_type<tc>, window_params = [{transform_indices = @transform_0, window_bounds = array<i64: 16, 512>}, {transform_indices = @transform_1, window_bounds = array<i64: 512, 128>}, {pipeline_mode = #tpu.pipeline_mode<synchronous>, transform_indices = @transform_2, window_bounds = array<i64: 1, 128>}, {transform_indices = @transform_3, window_bounds = array<i64: 16, 128>}, {transform_indices = @transform_4, window_bounds = array<i64: 16, 128>}, {transform_indices = @transform_5, window_bounds = array<i64: 16, 1>}, {transform_indices = @transform_6, window_bounds = array<i64: 16, 1>}, {transform_indices = @transform_7, window_bounds = array<i64: 8, 128>}]} {
    %c0_i32 = arith.constant 0 : i32
    %0 = arith.cmpi eq, %arg1, %c0_i32 : i32
    %1 = arith.extui %0 : i1 to i32
    %c0_i32_0 = arith.constant 0 : i32
    %2 = arith.cmpi ne, %1, %c0_i32_0 : i32
    scf.if %2 {
      %cst_9 = arith.constant 0.000000e+00 : f32
      %12 = vector.broadcast %cst_9 : f32 to vector<16x128xf32>
      %c0_10 = arith.constant 0 : index
      %c0_11 = arith.constant 0 : index
      %13 = vector.load %arg10[%c0_10, %c0_11] : memref<16x128xf32, #tpu.memory_space<vmem>>, vector<16x128xf32>
      tpu.vector_store %arg10[%c0_10, %c0_11], %12 {strides = array<i32>} : memref<16x128xf32, #tpu.memory_space<vmem>>, vector<16x128xf32>,
    } else {
    }
    %c0 = arith.constant 0 : index
    %c0_1 = arith.constant 0 : index
    %3 = vector.load %arg10[%c0, %c0_1] : memref<16x128xf32, #tpu.memory_space<vmem>>, vector<16x128xf32>
    %c0_2 = arith.constant 0 : index
    %c0_3 = arith.constant 0 : index
    %4 = vector.load %arg2[%c0_2, %c0_3] : memref<16x512xbf16, #tpu.memory_space<vmem>>, vector<16x512xbf16>
    %c0_4 = arith.constant 0 : index
    %c0_5 = arith.constant 0 : index
    %5 = vector.load %arg3[%c0_4, %c0_5] : memref<512x128xbf16, #tpu.memory_space<vmem>>, vector<512x128xbf16>
    %cst = arith.constant dense<0.000000e+00> : vector<16x128xf32>
    %6 = tpu.matmul %4, %5, %cst {dimension_numbers = #tpu.dot_dimension_numbers<[1], [0], [0], [1], [0, 0, 1, 1], [], []>} : vector<16x512xbf16>, vector<512x128xbf16>, vector<16x128xf32> -> vector<16x128xf32>
    %7 = arith.addf %3, %6 : vector<16x128xf32>
    %c0_6 = arith.constant 0 : index
    %c0_7 = arith.constant 0 : index
    %8 = vector.load %arg10[%c0_6, %c0_7] : memref<16x128xf32, #tpu.memory_space<vmem>>, vector<16x128xf32>
    tpu.vector_store %arg10[%c0_6, %c0_7], %7 {strides = array<i32>} : memref<16x128xf32, #tpu.memory_space<vmem>>, vector<16x128xf32>,
    %c1_i32 = arith.constant 1 : i32
    %9 = arith.cmpi eq, %arg1, %c1_i32 : i32
    %10 = arith.extui %9 : i1 to i32
    %c0_i32_8 = arith.constant 0 : i32
    %11 = arith.cmpi ne, %10, %c0_i32_8 : i32
    scf.if %11 {
      %c0_9 = arith.constant 0 : index
      %c0_10 = arith.constant 0 : index
      %12 = vector.load %arg10[%c0_9, %c0_10] : memref<16x128xf32, #tpu.memory_space<vmem>>, vector<16x128xf32>
      %c0_11 = arith.constant 0 : index
      %c0_12 = arith.constant 0 : index
      %13 = vector.load %arg4[%c0_11, %c0_12] : memref<1x128xf32, #tpu.memory_space<vmem>>, vector<1x128xf32>
      %14 = vector.broadcast %13 : vector<1x128xf32> to vector<16x128xf32>
      %15 = arith.addf %12, %14 : vector<16x128xf32>
      %16 = tpu.iota {dimensions = array<i32: 1>} : vector<16x128xi32>
      %c16_i32 = arith.constant 16 : i32
      %17 = vector.broadcast %c16_i32 : i32 to vector<16x128xi32>
      %18 = arith.cmpi slt, %16, %17 : vector<16x128xi32>
      %cst_13 = arith.constant -3.40282347E+38 : f32
      %19 = vector.broadcast %cst_13 : f32 to vector<16x128xf32>
      %20 = arith.select %18, %15, %19 : vector<16x128xi1>, vector<16x128xf32>
      %cst_14 = arith.constant dense<0xFF800000> : vector<16xf32>
      %21 = vector.multi_reduction <maximumf>, %20, %cst_14 [1] : vector<16x128xf32> to vector<16xf32>
      %22 = vector.shape_cast %21 : vector<16xf32> to vector<16x1xf32>
      %23 = vector.broadcast %22 : vector<16x1xf32> to vector<16x128xf32>
      %24 = arith.cmpf oeq, %15, %23 : vector<16x128xf32>
      %25 = arith.andi %18, %24 : vector<16x128xi1>
      %c128_i32 = arith.constant 128 : i32
      %26 = vector.broadcast %c128_i32 : i32 to vector<16x128xi32>
      %27 = arith.select %25, %16, %26 : vector<16x128xi1>, vector<16x128xi32>
      %cst_15 = arith.constant dense<2147483647> : vector<16xi32>
      %28 = vector.multi_reduction <minsi>, %27, %cst_15 [1] : vector<16x128xi32> to vector<16xi32>
      %29 = vector.shape_cast %28 : vector<16xi32> to vector<16x1xi32>
      %c0_16 = arith.constant 0 : index
      %c0_17 = arith.constant 0 : index
      %30 = vector.load %arg8[%c0_16, %c0_17] : memref<16x1xf32, #tpu.memory_space<vmem>>, vector<16x1xf32>
      %c0_18 = arith.constant 0 : index
      %c0_19 = arith.constant 0 : index
      %31 = vector.load %arg5[%c0_18, %c0_19] : memref<16x128xf32, #tpu.memory_space<vmem>>, vector<16x128xf32>
      %c0_20 = arith.constant 0 : index
      %c0_21 = arith.constant 0 : index
      %32 = vector.load %arg7[%c0_20, %c0_21] : memref<16x1xi32, #tpu.memory_space<vmem>>, vector<16x1xi32>
      %cst_22 = arith.constant -3.40282347E+38 : f32
      %33 = vector.broadcast %cst_22 : f32 to vector<16x128xf32>
      %34 = arith.select %18, %31, %33 : vector<16x128xi1>, vector<16x128xf32>
      %cst_23 = arith.constant dense<0xFF800000> : vector<16xf32>
      %35 = vector.multi_reduction <maximumf>, %34, %cst_23 [1] : vector<16x128xf32> to vector<16xf32>
      %36 = vector.shape_cast %35 : vector<16xf32> to vector<16x1xf32>
      %37 = vector.broadcast %36 : vector<16x1xf32> to vector<16x128xf32>
      %38 = arith.subf %31, %37 : vector<16x128xf32>
      %39 = math.exp %38 : vector<16x128xf32>
      %cst_24 = arith.constant 0.000000e+00 : f32
      %40 = vector.broadcast %cst_24 : f32 to vector<16x128xf32>
      %41 = arith.select %18, %39, %40 : vector<16x128xi1>, vector<16x128xf32>
      %cst_25 = arith.constant dense<0.000000e+00> : vector<16xf32>
      %42 = vector.multi_reduction <add>, %41, %cst_25 [1] : vector<16x128xf32> to vector<16xf32>
      %43 = vector.shape_cast %42 : vector<16xf32> to vector<16x1xf32>
      %44 = math.log %43 : vector<16x1xf32>
      %45 = vector.broadcast %44 : vector<16x1xf32> to vector<16x128xf32>
      %46 = arith.subf %38, %45 : vector<16x128xf32>
      %47 = vector.broadcast %32 : vector<16x1xi32> to vector<16x128xi32>
      %48 = arith.cmpi eq, %16, %47 : vector<16x128xi32>
      %cst_26 = arith.constant 0.000000e+00 : f32
      %49 = vector.broadcast %cst_26 : f32 to vector<16x128xf32>
      %50 = arith.select %48, %46, %49 : vector<16x128xi1>, vector<16x128xf32>
      %cst_27 = arith.constant dense<0.000000e+00> : vector<16xf32>
      %51 = vector.multi_reduction <add>, %50, %cst_27 [1] : vector<16x128xf32> to vector<16xf32>
      %52 = vector.shape_cast %51 : vector<16xf32> to vector<16x1xf32>
      %cst_28 = arith.constant 0.000000e+00 : f32
      %53 = vector.broadcast %cst_28 : f32 to vector<16x1xf32>
      %54 = arith.subf %53, %52 : vector<16x1xf32>
      %cst_29 = arith.constant 0.000000e+00 : f32
      %55 = vector.broadcast %cst_29 : f32 to vector<16x128xf32>
      %56 = arith.select %18, %46, %55 : vector<16x128xi1>, vector<16x128xf32>
      %cst_30 = arith.constant dense<0.000000e+00> : vector<16xf32>
      %57 = vector.multi_reduction <add>, %56, %cst_30 [1] : vector<16x128xf32> to vector<16xf32>
      %58 = vector.shape_cast %57 : vector<16xf32> to vector<16x1xf32>
      %cst_31 = arith.constant 0.000000e+00 : f32
      %59 = vector.broadcast %cst_31 : f32 to vector<16x1xf32>
      %60 = arith.subf %59, %58 : vector<16x1xf32>
      %cst_32 = arith.constant 1.600000e+01 : f32
      %61 = vector.broadcast %cst_32 : f32 to vector<16x1xf32>
      %62 = arith.divf %60, %61 : vector<16x1xf32>
      %cst_33 = arith.constant 0.899999976 : f32
      %63 = vector.broadcast %cst_33 : f32 to vector<16x1xf32>
      %64 = arith.mulf %63, %54 : vector<16x1xf32>
      %cst_34 = arith.constant 1.000000e-01 : f32
      %65 = vector.broadcast %cst_34 : f32 to vector<16x1xf32>
      %66 = arith.mulf %65, %62 : vector<16x1xf32>
      %67 = arith.addf %64, %66 : vector<16x1xf32>
      %68 = arith.mulf %67, %30 : vector<16x1xf32>
      %cst_35 = arith.constant dense<0.000000e+00> : vector<1xf32>
      %69 = vector.multi_reduction <add>, %68, %cst_35 [0] : vector<16x1xf32> to vector<1xf32>
      %70 = vector.shape_cast %69 : vector<1xf32> to vector<1x1xf32>
      %c0_36 = arith.constant 0 : index
      %c0_37 = arith.constant 0 : index
      %71 = vector.load %arg6[%c0_36, %c0_37] : memref<16x128xf32, #tpu.memory_space<vmem>>, vector<16x128xf32>
      %cst_38 = arith.constant -3.40282347E+38 : f32
      %72 = vector.broadcast %cst_38 : f32 to vector<16x128xf32>
      %73 = arith.select %18, %71, %72 : vector<16x128xi1>, vector<16x128xf32>
      %cst_39 = arith.constant dense<0xFF800000> : vector<16xf32>
      %74 = vector.multi_reduction <maximumf>, %73, %cst_39 [1] : vector<16x128xf32> to vector<16xf32>
      %75 = vector.shape_cast %74 : vector<16xf32> to vector<16x1xf32>
      %76 = vector.broadcast %75 : vector<16x1xf32> to vector<16x128xf32>
      %77 = arith.subf %71, %76 : vector<16x128xf32>
      %78 = math.exp %77 : vector<16x128xf32>
      %cst_40 = arith.constant 0.000000e+00 : f32
      %79 = vector.broadcast %cst_40 : f32 to vector<16x128xf32>
      %80 = arith.select %18, %78, %79 : vector<16x128xi1>, vector<16x128xf32>
      %cst_41 = arith.constant dense<0.000000e+00> : vector<16xf32>
      %81 = vector.multi_reduction <add>, %80, %cst_41 [1] : vector<16x128xf32> to vector<16xf32>
      %82 = vector.shape_cast %81 : vector<16xf32> to vector<16x1xf32>
      %83 = math.log %82 : vector<16x1xf32>
      %84 = vector.broadcast %83 : vector<16x1xf32> to vector<16x128xf32>
      %85 = arith.subf %77, %84 : vector<16x128xf32>
      %86 = vector.broadcast %29 : vector<16x1xi32> to vector<16x128xi32>
      %87 = arith.cmpi eq, %16, %86 : vector<16x128xi32>
      %cst_42 = arith.constant 0.000000e+00 : f32
      %88 = vector.broadcast %cst_42 : f32 to vector<16x128xf32>
      %89 = arith.select %87, %85, %88 : vector<16x128xi1>, vector<16x128xf32>
      %cst_43 = arith.constant dense<0.000000e+00> : vector<16xf32>
      %90 = vector.multi_reduction <add>, %89, %cst_43 [1] : vector<16x128xf32> to vector<16xf32>
      %91 = vector.shape_cast %90 : vector<16xf32> to vector<16x1xf32>
      %cst_44 = arith.constant 0.000000e+00 : f32
      %92 = vector.broadcast %cst_44 : f32 to vector<16x1xf32>
      %93 = arith.subf %92, %91 : vector<16x1xf32>
      %94 = arith.mulf %93, %30 : vector<16x1xf32>
      %cst_45 = arith.constant dense<0.000000e+00> : vector<1xf32>
      %95 = vector.multi_reduction <add>, %94, %cst_45 [0] : vector<16x1xf32> to vector<1xf32>
      %96 = vector.shape_cast %95 : vector<1xf32> to vector<1x1xf32>
      %97 = tpu.iota {dimensions = array<i32: 0>} : vector<8x128xi32>
      %98 = tpu.iota {dimensions = array<i32: 1>} : vector<8x128xi32>
      %c0_i32_46 = arith.constant 0 : i32
      %99 = vector.broadcast %c0_i32_46 : i32 to vector<8x128xi32>
      %100 = arith.cmpi eq, %97, %99 : vector<8x128xi32>
      %c0_i32_47 = arith.constant 0 : i32
      %101 = vector.broadcast %c0_i32_47 : i32 to vector<8x128xi32>
      %102 = arith.cmpi eq, %98, %101 : vector<8x128xi32>
      %103 = arith.andi %100, %102 : vector<8x128xi1>
      %c0_i32_48 = arith.constant 0 : i32
      %104 = vector.broadcast %c0_i32_48 : i32 to vector<8x128xi32>
      %105 = arith.cmpi eq, %97, %104 : vector<8x128xi32>
      %c1_i32_49 = arith.constant 1 : i32
      %106 = vector.broadcast %c1_i32_49 : i32 to vector<8x128xi32>
      %107 = arith.cmpi eq, %98, %106 : vector<8x128xi32>
      %108 = arith.andi %105, %107 : vector<8x128xi1>
      %cst_50 = arith.constant 0.000000e+00 : f32
      %109 = vector.shape_cast %96 : vector<1x1xf32> to vector<1x1xf32>
      %110 = vector.broadcast %109 : vector<1x1xf32> to vector<8x128xf32>
      %111 = vector.broadcast %cst_50 : f32 to vector<8x128xf32>
      %112 = arith.select %108, %110, %111 : vector<8x128xi1>, vector<8x128xf32>
      %113 = vector.shape_cast %70 : vector<1x1xf32> to vector<1x1xf32>
      %114 = vector.broadcast %113 : vector<1x1xf32> to vector<8x128xf32>
      %115 = arith.select %103, %114, %112 : vector<8x128xi1>, vector<8x128xf32>
      %c0_51 = arith.constant 0 : index
      %c0_52 = arith.constant 0 : index
      %116 = vector.load %arg9[%c0_51, %c0_52] : memref<8x128xf32, #tpu.memory_space<vmem>>, vector<8x128xf32>
      tpu.vector_store %arg9[%c0_51, %c0_52], %115 {strides = array<i32>} : memref<8x128xf32, #tpu.memory_space<vmem>>, vector<8x128xf32>,
    } else {
    }
    return
  }
  func.func @transform_0(%arg0: i32, %arg1: i32) -> (i32, i32) {
    %c0_i32 = arith.constant 0 : i32
    return %arg0, %arg1 : i32, i32
  }
  func.func @transform_1(%arg0: i32, %arg1: i32) -> (i32, i32) {
    %c0_i32 = arith.constant 0 : i32
    %c0_i32_0 = arith.constant 0 : i32
    return %arg1, %c0_i32 : i32, i32
  }
  func.func @transform_2(%arg0: i32, %arg1: i32) -> (i32, i32) {
    %c0_i32 = arith.constant 0 : i32
    %c0_i32_0 = arith.constant 0 : i32
    %c0_i32_1 = arith.constant 0 : i32
    return %c0_i32, %c0_i32_0 : i32, i32
  }
  func.func @transform_3(%arg0: i32, %arg1: i32) -> (i32, i32) {
    %c0_i32 = arith.constant 0 : i32
    %c0_i32_0 = arith.constant 0 : i32
    return %arg0, %c0_i32 : i32, i32
  }
  func.func @transform_4(%arg0: i32, %arg1: i32) -> (i32, i32) {
    %c0_i32 = arith.constant 0 : i32
    %c0_i32_0 = arith.constant 0 : i32
    return %arg0, %c0_i32 : i32, i32
  }
  func.func @transform_5(%arg0: i32, %arg1: i32) -> (i32, i32) {
    %c0_i32 = arith.constant 0 : i32
    %c0_i32_0 = arith.constant 0 : i32
    return %arg0, %c0_i32 : i32, i32
  }
  func.func @transform_6(%arg0: i32, %arg1: i32) -> (i32, i32) {
    %c0_i32 = arith.constant 0 : i32
    %c0_i32_0 = arith.constant 0 : i32
    return %arg0, %c0_i32 : i32, i32
  }
  func.func @transform_7(%arg0: i32, %arg1: i32) -> (i32, i32) {
    %c0_i32 = arith.constant 0 : i32
    %c0_i32_0 = arith.constant 0 : i32
    return %arg0, %c0_i32 : i32, i32
  }
}

</mosaic_0001>

<bundles_post_ra>
// kernel: deit_loss.1
= control target key start
LH: loop header
LB: loop body
LE: loop exit
PB: predicated region body
PF: predicated region fallthrough
CT: control target
= control target key end

     0   :  { %s1471_s24 = smov 0   ;;  %s1473_s25 = smov 0   ;;  %s1665_s0 = inlined_call_operand.vmem [shape: bf16[16,1024], index: 0, kind: input, shape index: {}]   ;;  %s1666_s1 = inlined_call_operand.vmem [shape: bf16[1024,128], index: 1, kind: input, shape index: {}]   ;;  %s1667_s2 = inlined_call_operand.vmem [shape: f32[1,128], index: 2, kind: input, shape index: {}]   ;;  %s1668_s3 = inlined_call_operand.vmem [shape: f32[16,128], index: 3, kind: input, shape index: {}]   ;;  %s1669_s4 = inlined_call_operand.vmem [shape: f32[16,128], index: 4, kind: input, shape index: {}]   ;;  %s1670_s5 = inlined_call_operand.vmem [shape: s32[16,1], index: 5, kind: input, shape index: {}]   ;;  %s1671_s6 = inlined_call_operand.vmem [shape: f32[16,1], index: 6, kind: input, shape index: {}]   ;;  %s1672_s7 = inlined_call_operand.vmem [shape: f32[8,128], index: 7, kind: output, shape index: {}]  }
   0x1   :  { %s1475_s26 = smov 0   ;;  %s1477_s27 = smov 0  }
   0x2   :  { %s1479_s28 = smov 0  }
   0x3 LB: > { %s26_s29 = sadd.s32 1, %s1422_s27  ;;  %p45_p1 = scmp.ne.s32.totalorder %s1414_s25, %s1410_s24  ;;  %s1426_s28 = sphi %s1479_s28, %s17_s28   ;;  %s1422_s27 = sphi %s1477_s27, %s1676_s27   ;;  %s1418_s26 = sphi %s1475_s26, %s1675_s26   ;;  %s1414_s25 = sphi %s1473_s25, %s1674_s25   ;;  %s1410_s24 = sphi %s1471_s24, %s1673_s24  }
   0x4   : > { %p27_p0 = scmp.ge.s32.totalorder %s26_s29, 2  ;;  %p46_p2 = scmp.eq.s32.totalorder %s1426_s28, 0 }
   0x5   : > { %s38_s8 = sadd.s32 1, %s1414_s25  ;;  %p1129_p5 = scmp.ge.s32.totalorder %s1426_s28, 2 }
   0x6   : > { %s1678_s29 = smov (%p27_p0, %s26_s29), 0  ;;  %p47_p3 = por %p46_p2, %p45_p1 }
   0x7   : > { %s34_s30 = ssub.s32 %s1422_s27, %s1678_s29  ;;  %287 = sbr.rel (%p1129_p5) target bundleno = 20 (0x14), region = 36 }
   0x8   : > { %p36_p4 = scmp.eq.s32.totalorder %s34_s30, 0 }
   0xa   : > { %s1506_s9 = scalar_select %p36_p4, %s1414_s25, %s38_s8  }
   0xc   : > { %290 = sbr.rel (!%p47_p3) target bundleno = 20 (0x14), region = 40  ;;  %s292_s10 = sand.u32 (%p47_p3), 1, %s1414_s25  }
   0xd   : > { %s1286_s11 = sshll.u32 (%p47_p3), %s1422_s27, 4  ;;  %s1130_s12 = sshll.u32 (%p47_p3), %s292_s10, 5 }
   0xe   : > { %s300_s15 = scalar_lea.vmem (%p47_p3), %s1665_s0, %s1286_s11  ;;  %s294_s16 = scalar_lea.vmem (%p47_p3), [#allocation3], %s1130_s12 }
   0xf   : > { %v313_v0 = vld [vmem:[%s300_s15] sm:$0xff] (%p47_p3)  ;;  %v315_v1 = vld [vmem:[%s300_s15 + $0x8] sm:$0xff] (%p47_p3) }
  0x10   : > { %v317_v2 = vld [vmem:[%s300_s15 + $0x20] sm:$0xff] (%p47_p3)  ;;  %314 = vst [vmem:[%s294_s16] sm:$0xff] (%p47_p3), %v313_v0  ;;  %v319_v3 = vld [vmem:[%s300_s15 + $0x28] sm:$0xff] (%p47_p3) }
  0x11   : > { %316 = vst [vmem:[%s294_s16 + $0x8] sm:$0xff] %v315_v1 }
  0x12   : > { %318 = vst [vmem:[%s294_s16 + $0x10] sm:$0xff] %v317_v2 }
  0x13   : > { %320 = vst [vmem:[%s294_s16 + $0x18] sm:$0xff] %v319_v3 }
  0x14 PF: > { %p1133_p6 = scmp.ge.s32.totalorder %s1426_s28, 1  ;;  %p334_p7 = scmp.lt.s32.totalorder %s1426_s28, 3 }
  0x16   : > { %p335_p8 = pnand %p1133_p6, %p334_p7 }
  0x17   : > { %s341_s17 = sand.u32 (!%p335_p8), 1, %s1410_s24   ;;  %s1135_s18 = sshll.u32 (!%p335_p8), %s1418_s26, 6 }
  0x18   : > { %338 = sbr.rel (%p335_p8) target bundleno = 859 (0x35b), region = 67  ;;  %s1134_s19 = sshll.u32 (!%p335_p8), %s341_s17, 5 }
  0x19   : > { %p399_p9 = scmp.lt.s32.totalorder (!%p335_p8), %s1135_s18, 127  ;;  %s1523_s30 = scalar_lea.vmem (!%p335_p8), [#allocation3], %s1134_s19 }
  0x1a   : > { %p1137_p10 = scmp.ne.s32.totalorder (!%p335_p8), %s1418_s26, 0 }
  0x1d   : > { %s1680_s18 = smov (!%p399_p9, %s1135_s18), 127  ;;  %435 = sbr.rel (%p1137_p10) target bundleno = 37 (0x25), region = 75 }
  0x1e   : > { %s1136_s20 = sshll.u32 %s1680_s18, 2 }
  0x1f   : > { %s1521_s23 = scalar_lea.vmem %s1666_s1, %s1136_s20 }
  0x22   : > { %v1428_v4 = vmov 0.0  }
  0x23   : > { %436 = vst [vmem:[#allocation2] sm:$0xff] %v1428_v4 }
  0x24   : > { %437 = vst [vmem:[#allocation2 + $0x8] sm:$0xff] %v1428_v4 }
  0x25 PF: > { %v1298_v5 = vld [vmem:[%s1521_s23 + $0x38] sm:$0xff]  ;;  %v1297_v9 = vld [vmem:[%s1521_s23 + $0x30] sm:$0xff]  ;;  %v1296_v13 = vld [vmem:[%s1521_s23 + $0x28] sm:$0xff]  ;;  %p1282_p11 = scmp.ne.s32.totalorder %s1418_s26, 1 }
  0x26   : > { %v1306_v6 = vld [vmem:[%s1521_s23 + $0x78] sm:$0xff]  ;;  %720 = vmatpush.bf16.msra.mxu0 %v1298_v5  ;;  %v1305_v10 = vld [vmem:[%s1521_s23 + $0x70] sm:$0xff]  ;;  %v1304_v14 = vld [vmem:[%s1521_s23 + $0x68] sm:$0xff] }
  0x27   : > { %v1314_v7 = vld [vmem:[%s1521_s23 + $0xb8] sm:$0xff]  ;;  %734 = vmatpush.bf16.msra.mxu1 %v1306_v6  ;;  %v1313_v11 = vld [vmem:[%s1521_s23 + $0xb0] sm:$0xff]  ;;  %v1312_v15 = vld [vmem:[%s1521_s23 + $0xa8] sm:$0xff] }
  0x28   : > { %v1322_v8 = vld [vmem:[%s1521_s23 + $0xf8] sm:$0xff]  ;;  %748 = vmatpush.bf16.msra.mxu2 %v1314_v7  ;;  %v1321_v12 = vld [vmem:[%s1521_s23 + $0xf0] sm:$0xff]  ;;  %v1320_v16 = vld [vmem:[%s1521_s23 + $0xe8] sm:$0xff] }
  0x29   : > { %762 = vmatpush.bf16.msra.mxu3 %v1322_v8  ;;  %v1295_v17 = vld [vmem:[%s1521_s23 + $0x20] sm:$0xff]  ;;  %v1294_v21 = vld [vmem:[%s1521_s23 + $0x18] sm:$0xff]  ;;  %v1293_v25 = vld [vmem:[%s1521_s23 + $0x10] sm:$0xff] }
  0x2a   : > { %721 = vmatpush.bf16.msra.mxu0 %v1297_v9  ;;  %v1303_v18 = vld [vmem:[%s1521_s23 + $0x60] sm:$0xff]  ;;  %v1302_v22 = vld [vmem:[%s1521_s23 + $0x58] sm:$0xff]  ;;  %v1301_v26 = vld [vmem:[%s1521_s23 + $0x50] sm:$0xff] }
  0x2b   : > { %735 = vmatpush.bf16.msra.mxu1 %v1305_v10  ;;  %v1311_v19 = vld [vmem:[%s1521_s23 + $0xa0] sm:$0xff]  ;;  %v1310_v23 = vld [vmem:[%s1521_s23 + $0x98] sm:$0xff]  ;;  %v1309_v27 = vld [vmem:[%s1521_s23 + $0x90] sm:$0xff] }
  0x2c   : > { %749 = vmatpush.bf16.msra.mxu2 %v1313_v11  ;;  %v1319_v20 = vld [vmem:[%s1521_s23 + $0xe0] sm:$0xff]  ;;  %v1318_v24 = vld [vmem:[%s1521_s23 + $0xd8] sm:$0xff]  ;;  %v1317_v28 = vld [vmem:[%s1521_s23 + $0xd0] sm:$0xff] }
  0x2d   : > { %763 = vmatpush.bf16.msra.mxu3 %v1321_v12  ;;  %v1292_v29 = vld [vmem:[%s1521_s23 + $0x8] sm:$0xff]  ;;  %v1291_v33 = vld [vmem:[%s1521_s23] sm:$0xff]  ;;  %v1140_v37 = vld [vmem:[%s1523_s30] sm:$0xf] }
  0x2e   : > { %722 = vmatpush.bf16.msra.mxu0 %v1296_v13  ;;  %v1300_v30 = vld [vmem:[%s1521_s23 + $0x48] sm:$0xff]  ;;  %v1299_v34 = vld [vmem:[%s1521_s23 + $0x40] sm:$0xff]  ;;  %v1287_v39 = vld [vmem:[%s1523_s30 + $0x4] sm:$0xf] }
  0x2f   : > { %736 = vmatpush.bf16.msra.mxu1 %v1304_v14  ;;  %v1308_v31 = vld [vmem:[%s1521_s23 + $0x88] sm:$0xff]  ;;  %v1307_v35 = vld [vmem:[%s1521_s23 + $0x80] sm:$0xff]  ;;  %v1148_v41 = vld [vmem:[%s1523_s30 + $0x8] sm:$0xf] }
  0x30   : > { %750 = vmatpush.bf16.msra.mxu2 %v1312_v15  ;;  %v1316_v32 = vld [vmem:[%s1521_s23 + $0xc8] sm:$0xff]  ;;  %v1315_v36 = vld [vmem:[%s1521_s23 + $0xc0] sm:$0xff]  ;;  %v1288_v43 = vld [vmem:[%s1523_s30 + $0xc] sm:$0xf] }
  0x31   : > { %764 = vmatpush.bf16.msra.mxu3 %v1320_v16  ;;  %v1289_v38 = vld [vmem:[%s1523_s30 + $0xc] sm:$0xf0]  ;;  %v1142_v40 = vld [vmem:[%s1523_s30 + $0x10] sm:$0xf0]  ;;  %v1290_v42 = vld [vmem:[%s1523_s30 + $0x14] sm:$0xf0] }
  0x32   : > { %723 = vmatpush.bf16.msra.mxu0 %v1295_v17  ;;  %v1150_v44 = vld [vmem:[%s1523_s30 + $0x18] sm:$0xf0]  ;;  %v1141_v45 = vor.u32 %v1289_v38, %v1140_v37  ;;  %v1145_v46 = vor.u32 %v1287_v39, %v1142_v40  ;;  %v1149_v47 = vor.u32 %v1290_v42, %v1148_v41  ;;  %v438_v55 = vld [vmem:[#allocation2] sm:$0xff] }
  0x33   : > { %737 = vmatpush.bf16.msra.mxu1 %v1303_v18  ;;  %v1153_v48 = vor.u32 %v1288_v43, %v1150_v44  ;;  %v439_v63 = vld [vmem:[#allocation2 + $0x8] sm:$0xff] }
  0x34   : > { %751 = vmatpush.bf16.msra.mxu2 %v1311_v19 }
  0x35   : > { %765 = vmatpush.bf16.msra.mxu3 %v1319_v20 }
  0x36   : > { %724 = vmatpush.bf16.msra.mxu0 %v1294_v21 }
  0x37   : > { %738 = vmatpush.bf16.msra.mxu1 %v1302_v22 }
  0x38   : > { %752 = vmatpush.bf16.msra.mxu2 %v1310_v23 }
  0x39   : > { %766 = vmatpush.bf16.msra.mxu3 %v1318_v24 }
  0x3a   : > { %725 = vmatpush.bf16.msra.mxu0 %v1293_v25 }
  0x3b   : > { %739 = vmatpush.bf16.msra.mxu1 %v1301_v26 }
  0x3c   : > { %753 = vmatpush.bf16.msra.mxu2 %v1309_v27 }
  0x3d   : > { %767 = vmatpush.bf16.msra.mxu3 %v1317_v28 }
  0x3e   : > { %726 = vmatpush.bf16.msra.mxu0 %v1292_v29 }
  0x3f   : > { %740 = vmatpush.bf16.msra.mxu1 %v1300_v30 }
  0x40   : > { %754 = vmatpush.bf16.msra.mxu2 %v1308_v31 }
  0x41   : > { %768 = vmatpush.bf16.msra.mxu3 %v1316_v32 }
  0x42   : > { %727 = vmatpush.bf16.msra.mxu0 %v1291_v33 }
  0x43   : > { %741 = vmatpush.bf16.msra.mxu1 %v1299_v34 }
  0x44   : > { %755 = vmatpush.bf16.msra.mxu2 %v1307_v35 }
  0x45   : > { %769 = vmatpush.bf16.msra.mxu3 %v1315_v36  ;;  %728 = vmatmul.bf16.vlgmr.msra.gmra.mxu0 %v1141_v45 }
  0x46   : > { %742 = vmatmul.bf16.vlgmr.msra.gmra.mxu1 %v1145_v46 }
  0x47   : > { %756 = vmatmul.bf16.vlgmr.msra.gmra.mxu2 %v1149_v47 }
  0x48   : > { %770 = vmatmul.bf16.vlgmr.msra.gmra.mxu3 %v1153_v48 }
  0xc2   : > { %v729_v49 = vpop.f32.mrf.mxu0 }
  0xc3   : > { %v743_v50 = vpop.f32.mrf.mxu1 }
  0xc4   : > { %v744_v51 = vadd.f32 %v743_v50, %v729_v49 }
  0xca   : > { %v757_v52 = vpop.f32.mrf.mxu2  ;;  %v731_v57 = vpop.f32.mrf.mxu0 }
  0xcb   : > { %v771_v53 = vpop.f32.mrf.mxu3  ;;  %v758_v54 = vadd.f32 %v757_v52, %v744_v51  ;;  %v745_v58 = vpop.f32.mrf.mxu1 }
  0xcc   : > { %v746_v60 = vadd.f32 %v745_v58, %v731_v57 }
  0xcd   : > { %v772_v56 = vadd.f32 %v771_v53, %v758_v54 }
  0xcf   : > { %v776_v59 = vadd.f32 %v772_v56, %v438_v55 }
  0xd1   : > { %778 = vst [vmem:[#allocation2] sm:$0xff] %v776_v59 }
  0xd2   : > { %v759_v61 = vpop.f32.mrf.mxu2 }
  0xd3   : > { %v760_v62 = vadd.f32 %v759_v61, %v746_v60  ;;  %v773_v0 = vpop.f32.mrf.mxu3 }
  0xd5   : > { %v774_v1 = vadd.f32 %v773_v0, %v760_v62  ;;  %783 = sbr.rel (%p1282_p11) target bundleno = 859 (0x35b), region = 79 }
  0xd7   : > { %v777_v2 = vadd.f32 %v774_v1, %v439_v63 }
  0xd9   : > { %779 = vst [vmem:[#allocation2 + $0x8] sm:$0xff] %v777_v2 }
  0xda   : > { %v792_v3 = vlaneseq  ;;  %v784_v4 = vld [vmem:[#allocation2] sm:$0xff]  ;;  %v917_v14 = vld [vmem:[%s1669_s4 + $0x8] sm:$0xff]  ;;  %v1429_v20 = vmov 0   ;;  %vm906_vm12 = vcmask 7168  }
  0xdb   : > { %v1369_v5 = vld [vmem:[%s1667_s2] ss:$0 sm:$0xff]  ;;  %v838_v15 = vld [vmem:[%s1668_s3 + $0x8] sm:$0xff]  ;;  %1366 = vset.pattern.permute.xlu2 %v1429_v20  ;;  %1367 = vset.pattern.permute.xlu0 %v1429_v20 }
  0xdc   : > { %v1571_v6 = vand.u32 127, %v792_v3  ;;  %v916_v7 = vld [vmem:[%s1669_s4] sm:$0xff]  ;;  %v790_v9 = vadd.f32 %v1369_v5, %v784_v4  ;;  %1368 = vset.pattern.permute.xlu1 %v1429_v20  ;;  %v840_v1 = vld [vmem:[%s1670_s5 + $0x8] sm:$0xff] }
  0xdd   : > { %v837_v8 = vld [vmem:[%s1668_s3] sm:$0xff] }
  0xde   : > { %vm794_vm0 = vcmp.lt.s32.totalorder %v1571_v6, 16  ;;  %v839_v49 = vld [vmem:[%s1670_s5] sm:$0xff]  ;;  %vm968_vm14 = vcmp.eq.s32.totalorder %v1571_v6, 1  ;;  %vm966_vm15 = vcmp.eq.s32.totalorder %v1571_v6, 0 }
  0xdf   : > { %v918_v11 = vsel %vm794_vm0, %v916_v7, -3.4028235e+38  ;;  %v841_v12 = vsel %vm794_vm0, %v837_v8, -3.4028235e+38  ;;  %v795_v13 = vsel %vm794_vm0, %v790_v9, -3.4028235e+38 }
  0xe0   : > { %v785_v10 = vld [vmem:[#allocation2 + $0x8] sm:$0xff]  ;;  %920 = vmax.xlane.f32.xlu2 %v918_v11  ;;  %843 = vmax.xlane.f32.xlu1 %v841_v12  ;;  %v919_v17 = vsel %vm794_vm0, %v917_v14, -3.4028235e+38  ;;  %v842_v18 = vsel %vm794_vm0, %v838_v15, -3.4028235e+38 }
  0xe1   : > { %797 = vmax.xlane.f32.xlu0 %v795_v13  ;;  %v791_v16 = vadd.f32 %v1369_v5, %v785_v10 }
  0xe3   : > { %v796_v19 = vsel %vm794_vm0, %v791_v16, -3.4028235e+38 }
  0xe8   : > { %922 = vmax.xlane.f32.xlu2 %v919_v17  ;;  %845 = vmax.xlane.f32.xlu1 %v842_v18 }
  0xe9   : > { %799 = vmax.xlane.f32.xlu0 %v796_v19 }
 0x153   : > { %v921_v21 = vpop.xlane.xlu2 %920  ;;  %v844_v22 = vpop.xlane.xlu1 %843 }
 0x154   : > { %v847_v23 = vsub.f32 %v837_v8, %v844_v22  ;;  %v798_v24 = vpop.xlane.xlu0 %797  ;;  %v1600_v26 = vsub.f32 %v916_v7, %v921_v21 }
 0x155   : > { %vm801_vm1 = vcmp.eq.f32.partialorder %v790_v9, %v798_v24 }
 0x156   : > { %v849_v25 = vmul.f32 1.442695, %v847_v23  ;;  %vm803_vm2 = vmand %vm794_vm0, %vm801_vm1  ;;  %v926_v30 = vmul.f32 1.442695, %v1600_v26 }
 0x157   : > { %v805_v27 = vsel %vm803_vm2, %v1571_v6, 128 }
 0x158   : > { %v808_v28 = vshra.s32 %v805_v27, 16  ;;  %1370 = vpow2.f32 %v849_v25  ;;  %v807_v50 = vand.u32 65535, %v805_v27 }
 0x159   : > { %1372 = vpow2.f32 %v926_v30 }
 0x15a   : > { %v810_v29 = vcvt.s32.f32 %v808_v28  ;;  %v809_v52 = vcvt.s32.f32 %v807_v50 }
 0x15b   : > { %v923_v31 = vpop.xlane.xlu2 %922  ;;  %v846_v32 = vpop.xlane.xlu1 %845 }
 0x15c   : > { %v1604_v33 = vsub.f32 %v917_v14, %v923_v31  ;;  %v848_v34 = vsub.f32 %v838_v15, %v846_v32  ;;  %811 = vmin.xlane.f32.xlu0 %v810_v29  ;;  %v800_v35 = vpop.xlane.xlu0 %799  ;;  %v1430_v32 = vmov 16.0  }
 0x15d   : > { %vm802_vm3 = vcmp.eq.f32.partialorder %v791_v16, %v800_v35 }
 0x15e   : > { %v928_v36 = vmul.f32 1.442695, %v1604_v33  ;;  %v851_v37 = vmul.f32 1.442695, %v848_v34  ;;  %vm804_vm4 = vmand %vm794_vm0, %vm802_vm3  ;;  %v1371_v38 = vpop.eup %1370 }
 0x15f   : > { %v806_v39 = vsel %vm804_vm4, %v1571_v6, 128  ;;  %v853_v40 = vsel %vm794_vm0, %v1371_v38, 0.0  ;;  %v1373_v43 = vpop.eup %1372 }
 0x160   : > { %1374 = vpow2.f32 %v928_v36  ;;  %v822_v41 = vshra.s32 %v806_v39, 16  ;;  %855 = vadd.xlane.f32.xlu2 %v853_v40  ;;  %v930_v48 = vsel %vm794_vm0, %v1373_v43, 0.0  ;;  %v821_v54 = vand.u32 65535, %v806_v39 }
 0x161   : > { %1376 = vpow2.f32 %v851_v37 }
 0x162   : > { %v824_v42 = vcvt.s32.f32 %v822_v41  ;;  %v823_v57 = vcvt.s32.f32 %v821_v54 }
 0x164   : > { %825 = vmin.xlane.f32.xlu1 %v824_v42 }
 0x166   : > { %v1375_v44 = vpop.eup %1374 }
 0x167   : > { %v1377_v45 = vpop.eup %1376  ;;  %v931_v46 = vsel %vm794_vm0, %v1375_v44, 0.0 }
 0x168   : > { %v854_v47 = vsel %vm794_vm0, %v1377_v45, 0.0  ;;  %934 = vadd.xlane.f32.xlu2 %v931_v46  ;;  %v835_v45 = vld [vmem:[%s1671_s6] sm:$0xff]  ;;  %v836_v46 = vld [vmem:[%s1671_s6 + $0x8] sm:$0xff] }
 0x169   : > { %857 = vadd.xlane.f32.xlu0 %v854_v47 }
 0x16c   : > { %932 = vadd.xlane.f32.xlu1 %v930_v48 }
 0x180   : > { %866 = vperm.xlu2 %1366, %v839_v49  }
 0x1cf   : > { %v812_v51 = vpop.xlane.xlu0 %811 }
 0x1d0   : > { %vm813_vm5 = vcmp.eq.f32.partialorder %v810_v29, %v812_v51  ;;  %v818_v12 = vcvt.f32.s32 %v812_v51 }
 0x1d1   : > { %v814_v53 = vsel %vm813_vm5, %v809_v52, inf }
 0x1d2   : > { %815 = vmin.xlane.f32.xlu0 %v814_v53  ;;  %v819_v15 = vshll.u32 %v818_v12, 16 }
 0x1d3   : > { %v856_v55 = vpop.xlane.xlu2 %855 }
 0x1d4   : > { %1378 = vlog2.f32 %v856_v55 }
 0x1d7   : > { %v826_v56 = vpop.xlane.xlu1 %825 }
 0x1d8   : > { %vm827_vm6 = vcmp.eq.f32.partialorder %v824_v42, %v826_v56  ;;  %v832_v20 = vcvt.f32.s32 %v826_v56 }
 0x1d9   : > { %v828_v58 = vsel %vm827_vm6, %v823_v57, inf }
 0x1da   : > { %829 = vmin.xlane.f32.xlu1 %v828_v58  ;;  %v1379_v59 = vpop.eup %1378  ;;  %v833_v24 = vshll.u32 %v832_v20, 16  ;;  %v964_v20 = vshrl.u32 %v792_v3, 7 }
 0x1db   : > { %v860_v60 = vmul.f32 0.6931472, %v1379_v59  ;;  %v935_v0 = vpop.xlane.xlu2 %934 }
 0x1dc   : > { %v858_v61 = vpop.xlane.xlu0 %857  ;;  %vm965_vm13 = vcmp.eq.s32.totalorder %v964_v20, 0 }
 0x1dd   : > { %1380 = vlog2.f32 %v858_v61  ;;  %v863_v62 = vsub.f32 %v847_v23, %v860_v60  ;;  %vm967_vm1 = vmand %vm965_vm13, %vm966_vm15 }
 0x1df   : > { %v881_v63 = vsel %vm794_vm0, %v863_v62, 0.0  ;;  %v933_v10 = vpop.xlane.xlu1 %932 }
 0x1e0   : > { %1382 = vlog2.f32 %v933_v10 }
 0x1e1   : > { %1384 = vlog2.f32 %v935_v0 }
 0x1e2   : > { %883 = vadd.xlane.f32.xlu1 %v881_v63  ;;  %1386 = vrcp.f32 %v1430_v32 }
 0x1e3   : > { %v1381_v2 = vpop.eup %1380  ;;  %v867_v8 = vpop.permute.xlu2 %866 }
 0x1e4   : > { %v862_v4 = vmul.f32 0.6931472, %v1381_v2  ;;  %vm871_vm7 = vcmp.eq.s32.totalorder %v1571_v6, %v867_v8 }
 0x1e5   : > { %v873_v9 = vsel %vm871_vm7, %v863_v62, 0.0 }
 0x1e6   : > { %869 = vperm.xlu0 %1367, %v840_v1   ;;  %v864_v5 = vsub.f32 %v848_v34, %v862_v4  ;;  %v1383_v11 = vpop.eup %1382 }
 0x1e7   : > { %v937_v13 = vmul.f32 0.6931472, %v1383_v11  ;;  %v1385_v19 = vpop.eup %1384 }
 0x1e8   : > { %v882_v7 = vsel %vm794_vm0, %v864_v5, 0.0  ;;  %v939_v22 = vmul.f32 0.6931472, %v1385_v19  ;;  %v1387_v35 = vpop.eup %1386  ;;  %vm969_vm0 = vmand %vm965_vm13, %vm968_vm14 }
 0x1e9   : > { %v940_v18 = vsub.f32 %v1600_v26, %v937_v13  ;;  %v890_v36 = vmul.f32 16.0, %v1387_v35  ;;  %vm894_vm11 = vweird.f32 %v1387_v35 }
 0x1ea   : > { %885 = vadd.xlane.f32.xlu1 %v882_v7  ;;  %v941_v28 = vsub.f32 %v1604_v33, %v939_v22 }
 0x1eb   : > { %v891_v38 = vsub.f32 1.0, %v890_v36 }
 0x1ed   : > { %v892_v39 = vmul.f32 %v1387_v35, %v891_v38 }
 0x1ef   : > { %v893_v33 = vadd.f32 %v1387_v35, %v892_v39 }
 0x1f1   : > { %v895_v43 = vsel %vm894_vm11, %v1387_v35, %v893_v33 }
 0x1f2   : > { %875 = vadd.xlane.f32.xlu1 %v873_v9 }
 0x245   : > { %v816_v14 = vpop.xlane.xlu0 %815 }
 0x246   : > { %v817_v16 = vcvt.f32.s32 %v816_v14 }
 0x248   : > { %v820_v17 = vadd.s32 %v819_v15, %v817_v16 }
 0x24a   : > { %vm942_vm8 = vcmp.eq.s32.totalorder %v1571_v6, %v820_v17 }
 0x24b   : > { %v944_v21 = vsel %vm942_vm8, %v940_v18, 0.0 }
 0x24c   : > { %946 = vadd.xlane.f32.xlu1 %v944_v21 }
 0x24d   : > { %v830_v23 = vpop.xlane.xlu1 %829 }
 0x24e   : > { %v831_v25 = vcvt.f32.s32 %v830_v23 }
 0x250   : > { %v834_v27 = vadd.s32 %v833_v24, %v831_v25 }
 0x252   : > { %vm943_vm9 = vcmp.eq.s32.totalorder %v1571_v6, %v834_v27 }
 0x253   : > { %v945_v29 = vsel %vm943_vm9, %v941_v28, 0.0 }
 0x254   : > { %948 = vadd.xlane.f32.xlu1 %v945_v29 }
 0x255   : > { %v884_v31 = vpop.xlane.xlu1 %883 }
 0x256   : > { %v887_v42 = vsub.f32 0.0, %v884_v31 }
 0x258   : > { %v870_v30 = vpop.permute.xlu0 %869  ;;  %v896_v50 = vmul.f32 %v895_v43, %v887_v42 }
 0x259   : > { %vm872_vm10 = vcmp.eq.s32.totalorder %v1571_v6, %v870_v30 }
 0x25a   : > { %v874_v26 = vsel %vm872_vm10, %v864_v5, 0.0  ;;  %v900_v56 = vmul.f32 0.1, %v896_v50 }
 0x25b   : > { %877 = vadd.xlane.f32.xlu2 %v874_v26 }
 0x25d   : > { %v886_v34 = vpop.xlane.xlu1 %885 }
 0x25e   : > { %v888_v51 = vsub.f32 0.0, %v886_v34 }
 0x260   : > { %v897_v57 = vmul.f32 %v895_v43, %v888_v51 }
 0x262   : > { %v901_v63 = vmul.f32 0.1, %v897_v57 }
 0x265   : > { %v876_v37 = vpop.xlane.xlu1 %875 }
 0x266   : > { %v879_v44 = vsub.f32 0.0, %v876_v37 }
 0x268   : > { %v898_v53 = vmul.f32 0.9, %v879_v44 }
 0x26a   : > { %v902_v60 = vadd.f32 %v900_v56, %v898_v53 }
 0x26c   : > { %v904_v2 = vmul.f32 %v902_v60, %v835_v45 }
 0x26e   : > { %v907_v9 = vsel %vm906_vm12, %v904_v2, 0.0 }
 0x2bf   : > { %v947_v40 = vpop.xlane.xlu1 %946 }
 0x2c0   : > { %v950_v41 = vsub.f32 0.0, %v947_v40 }
 0x2c2   : > { %v952_v48 = vmul.f32 %v950_v41, %v835_v45 }
 0x2c4   : > { %v954_v54 = vsel %vm906_vm12, %v952_v48, 0.0 }
 0x2c7   : > { %v949_v47 = vpop.xlane.xlu1 %948 }
 0x2c8   : > { %v951_v49 = vsub.f32 0.0, %v949_v47 }
 0x2ca   : > { %v953_v52 = vmul.f32 %v951_v49, %v836_v46 }
 0x2cc   : > { %v955_v55 = vsel %vm906_vm12, %v953_v52, 0.0 }
 0x2cd   : > { %v956_v58 = vadd.f32 %v955_v55, %v954_v54 }
 0x2ce   : > { %v878_v59 = vpop.xlane.xlu2 %877 }
 0x2cf   : > { %v957_v61 = vrot.slane %v956_v58, 4  ;;  %v880_v62 = vsub.f32 0.0, %v878_v59 }
 0x2d1   : > { %v958_v0 = vadd.f32 %v957_v61, %v956_v58  ;;  %v899_v1 = vmul.f32 0.9, %v880_v62 }
 0x2d3   : > { %v903_v4 = vadd.f32 %v901_v63, %v899_v1  ;;  %v959_v5 = vrot.slane %v958_v0, 2 }
 0x2d5   : > { %v905_v7 = vmul.f32 %v903_v4, %v836_v46  ;;  %v960_v8 = vadd.f32 %v959_v5, %v958_v0 }
 0x2d7   : > { %v908_v10 = vsel %vm906_vm12, %v905_v7, 0.0  ;;  %v961_v11 = vrot.slane %v960_v8, 1 }
 0x2d8   : > { %v909_v12 = vadd.f32 %v908_v10, %v907_v9 }
 0x2d9   : > { %v962_v13 = vadd.f32 %v961_v11, %v960_v8 }
 0x2da   : > { %v910_v14 = vrot.slane %v909_v12, 4 }
 0x2db   : > { %972 = vperm.xlu0 %1367, %v962_v13  }
 0x2dc   : > { %v911_v15 = vadd.f32 %v910_v14, %v909_v12 }
 0x2de   : > { %v912_v16 = vrot.slane %v911_v15, 2 }
 0x2e0   : > { %v913_v17 = vadd.f32 %v912_v16, %v911_v15 }
 0x2e2   : > { %v914_v18 = vrot.slane %v913_v17, 1 }
 0x2e4   : > { %v915_v19 = vadd.f32 %v914_v18, %v913_v17 }
 0x2e6   : > { %978 = vperm.xlu1 %1368, %v915_v19  }
 0x34d   : > { %v973_v21 = vpop.permute.xlu0 %972 }
 0x34e   : > { %v975_v22 = vsel %vm969_vm0, %v973_v21, 0.0 }
 0x358   : > { %v979_v23 = vpop.permute.xlu1 %978 }
 0x359   : > { %v981_v24 = vsel %vm967_vm1, %v979_v23, %v975_v22 }
 0x35a   : > { %982 = vst [vmem:[%s1672_s7] sm:$0xff] %v981_v24 }
 0x35b PF: > { %s17_s28 = sadd.s32 1, %s1426_s28   ;;  %s1673_s24 = smov %s1414_s25 }
 0x35c   : > { %p14_p12 = scmp.ge.s32.totalorder %s17_s28, 4   ;;  %s1674_s25 = smov %s1506_s9 }
 0x35d   : > { %s1675_s26 = smov %s1422_s27  ;;  %s1676_s27 = smov %s1678_s29 }
 0x35e   :  { %16 = sbr.rel (!%p14_p12) target bundleno = 3 (0x3), region = 129 }

</bundles_post_ra>
